<compile_context>
chip_gen: v7x
topology: tpu7x:2x2x1
jax: 0.10.0
libtpu: 0.0.40
codegen_flags: <defaults>
</compile_context>

<pallas_src>
import math
from functools import partial

import jax
import jax.numpy as jnp
from jax.experimental import pallas as pl
from jax.experimental.pallas import tpu as pltpu

# ----------------------------- config (synthetic BERT) -----------------------------
HIDDEN = 768                    # fixed by classifier in_features=768
HEADS = 12
DH = HIDDEN // HEADS            # 64
INTER = 3072
LAYERS = 2                      # TODO(synk): bert-base-uncased has 12 layers; 2 synthetic layers keep the demo small.
EMB_VOCAB = 1000                # TODO(synk): real BERT vocab is 30522; synthetic embedding table instead of a checkpoint.
MAX_POS = 64
NUM_CLASSES = 64                # `vocab_size` ctor arg of TorchGRUIntent (classifier out_features)
CLS_PAD = 128                   # lane-dense padded classifier width (sliced back to NUM_CLASSES)
LN_EPS = 1e-12


def _vmem_limit_bytes():
    """Derive a safe VMEM budget (v5e/v6e: 128 MiB, v7x: 64 MiB per TC)."""
    cap = 64 * 1024 * 1024
    try:
        info = pltpu.get_tpu_info()
        cap = int(getattr(info, "vmem_capacity_bytes", cap))
    except Exception:
        pass
    # leave headroom for double-buffering / compiler scratch
    return min(int(cap * 3 // 4), 96 * 1024 * 1024)


VMEM_LIMIT = _vmem_limit_bytes()


def _row_tile(m, cap=512):
    """Largest divisor of m that is a multiple of 8 and <= cap (falls back to full m)."""
    for cand in range(min(cap, m), 0, -1):
        if m % cand == 0 and cand % 8 == 0:
            return cand
    return m


def _mosaic(grid_rank):
    return pltpu.CompilerParams(
        dimension_semantics=("parallel",) * grid_rank,
        vmem_limit_bytes=VMEM_LIMIT,
    )


# ----------------------------- Pallas kernels -----------------------------
def _linear_kernel(x_ref, w_ref, b_ref, o_ref):
    # o = x @ w + b ; bf16 operands, f32 accumulation.
    acc = jnp.dot(x_ref[...], w_ref[...], preferred_element_type=jnp.float32)
    o_ref[...] = (acc + b_ref[...].astype(jnp.float32)).astype(o_ref.dtype)


def linear(x, w, b, out_dtype=None, tm_cap=512):
    """Row-tiled linear; weights stay VMEM-resident across the M grid."""
    M, K = x.shape
    N = w.shape[1]
    out_dtype = out_dtype or x.dtype
    tm = _row_tile(M, tm_cap)
    return pl.pallas_call(
        _linear_kernel,
        out_shape=jax.ShapeDtypeStruct((M, N), out_dtype),
        grid=(M // tm,),
        in_specs=[
            pl.BlockSpec((tm, K), lambda i: (i, 0)),
            pl.BlockSpec((K, N), lambda i: (0, 0)),
            pl.BlockSpec((1, N), lambda i: (0, 0)),
        ],
        out_specs=pl.BlockSpec((tm, N), lambda i: (i, 0)),
        compiler_params=_mosaic(1),
    )(x, w, b.reshape(1, N))


def _ln_epilogue(acc_f32, g_ref, beta_ref, o_ref):
    mu = jnp.mean(acc_f32, axis=-1, keepdims=True)
    xc = acc_f32 - mu
    var = jnp.mean(xc * xc, axis=-1, keepdims=True)
    y = xc * jax.lax.rsqrt(var + LN_EPS)
    o_ref[...] = (y * g_ref[...].astype(jnp.float32)
                  + beta_ref[...].astype(jnp.float32)).astype(o_ref.dtype)


def _ln_kernel(x_ref, g_ref, b_ref, o_ref):
    _ln_epilogue(x_ref[...].astype(jnp.float32), g_ref, b_ref, o_ref)


def layernorm(x, g, b, out_dtype=None):
    M, D = x.shape
    out_dtype = out_dtype or x.dtype
    tm = _row_tile(M)
    return pl.pallas_call(
        _ln_kernel,
        out_shape=jax.ShapeDtypeStruct((M, D), out_dtype),
        grid=(M // tm,),
        in_specs=[
            pl.BlockSpec((tm, D), lambda i: (i, 0)),
            pl.BlockSpec((1, D), lambda i: (0, 0)),
            pl.BlockSpec((1, D), lambda i: (0, 0)),
        ],
        out_specs=pl.BlockSpec((tm, D), lambda i: (i, 0)),
        compiler_params=_mosaic(1),
    )(x, g.reshape(1, D), b.reshape(1, D))


def _linear_add_ln_kernel(x_ref, w_ref, b_ref, r_ref, g_ref, beta_ref, o_ref):
    # o = LayerNorm(x @ w + b + residual) * g + beta  (fused matmul epilogue)
    acc = jnp.dot(x_ref[...], w_ref[...], preferred_element_type=jnp.float32)
    acc = acc + b_ref[...].astype(jnp.float32) + r_ref[...].astype(jnp.float32)
    _ln_epilogue(acc, g_ref, beta_ref, o_ref)


def linear_add_ln(x, w, b, res, g, beta, tm_cap=512):
    M, K = x.shape
    N = w.shape[1]
    tm = _row_tile(M, tm_cap)
    return pl.pallas_call(
        _linear_add_ln_kernel,
        out_shape=jax.ShapeDtypeStruct((M, N), x.dtype),
        grid=(M // tm,),
        in_specs=[
            pl.BlockSpec((tm, K), lambda i: (i, 0)),
            pl.BlockSpec((K, N), lambda i: (0, 0)),
            pl.BlockSpec((1, N), lambda i: (0, 0)),
            pl.BlockSpec((tm, N), lambda i: (i, 0)),
            pl.BlockSpec((1, N), lambda i: (0, 0)),
            pl.BlockSpec((1, N), lambda i: (0, 0)),
        ],
        out_specs=pl.BlockSpec((tm, N), lambda i: (i, 0)),
        compiler_params=_mosaic(1),
    )(x, w, b.reshape(1, N), res, g.reshape(1, N), beta.reshape(1, N))


def _ffn_add_ln_kernel(x_ref, w1_ref, b1_ref, w2_ref, b2_ref, r_ref, g_ref, beta_ref, o_ref):
    h = jnp.dot(x_ref[...], w1_ref[...], preferred_element_type=jnp.float32)
    h = h + b1_ref[...].astype(jnp.float32)
    # TODO(synk): BERT uses erf-based GELU; tanh approximation keeps the Mosaic lowering simple.
    h = 0.5 * h * (1.0 + jnp.tanh(0.7978845608028654 * (h + 0.044715 * h * h * h)))
    acc = jnp.dot(h.astype(w2_ref.dtype), w2_ref[...], preferred_element_type=jnp.float32)
    acc = acc + b2_ref[...].astype(jnp.float32) + r_ref[...].astype(jnp.float32)
    _ln_epilogue(acc, g_ref, beta_ref, o_ref)


def ffn_add_ln(x, w1, b1, w2, b2, res, g, beta, tm_cap=256):
    M = x.shape[0]
    tm = _row_tile(M, tm_cap)   # keep (tm, 3072) f32 intermediate modest for v7x's 64 MiB VMEM
    return pl.pallas_call(
        _ffn_add_ln_kernel,
        out_shape=jax.ShapeDtypeStruct((M, HIDDEN), x.dtype),
        grid=(M // tm,),
        in_specs=[
            pl.BlockSpec((tm, HIDDEN), lambda i: (i, 0)),
            pl.BlockSpec((HIDDEN, INTER), lambda i: (0, 0)),
            pl.BlockSpec((1, INTER), lambda i: (0, 0)),
            pl.BlockSpec((INTER, HIDDEN), lambda i: (0, 0)),
            pl.BlockSpec((1, HIDDEN), lambda i: (0, 0)),
            pl.BlockSpec((tm, HIDDEN), lambda i: (i, 0)),
            pl.BlockSpec((1, HIDDEN), lambda i: (0, 0)),
            pl.BlockSpec((1, HIDDEN), lambda i: (0, 0)),
        ],
        out_specs=pl.BlockSpec((tm, HIDDEN), lambda i: (i, 0)),
        compiler_params=_mosaic(1),
    )(x, w1, b1.reshape(1, INTER), w2, b2.reshape(1, HIDDEN), res,
      g.reshape(1, HIDDEN), beta.reshape(1, HIDDEN))


def _attention_kernel(q_ref, k_ref, v_ref, m_ref, o_ref, *, scale):
    # q/k/v blocks: (HEADS, S, Dh) for one batch; m block: (1, 1, S) additive mask.
    s = jnp.einsum('hqd,hkd->hqk', q_ref[...], k_ref[...],
                   preferred_element_type=jnp.float32)
    s = s * scale + m_ref[...].astype(jnp.float32)
    mx = jnp.max(s, axis=-1, keepdims=True)
    p = jnp.exp(s - mx)
    denom = jnp.sum(p, axis=-1, keepdims=True)
    p = p * pl.reciprocal(denom, approx=True)          # EUP slot, not VPU divide
    ctx = jnp.einsum('hqk,hkd->hqd', p.astype(v_ref.dtype), v_ref[...],
                     preferred_element_type=jnp.float32)
    o_ref[...] = ctx.astype(o_ref.dtype)


def attention(q, k, v, addmask):
    # q/k/v: (B*H, S, Dh); addmask: (B, 1, S) additive mask, mapped per batch in the index_map.
    BH, S, Dh = q.shape
    B = addmask.shape[0]
    H = BH // B
    return pl.pallas_call(
        partial(_attention_kernel, scale=1.0 / math.sqrt(Dh)),
        out_shape=jax.ShapeDtypeStruct((BH, S, Dh), q.dtype),
        grid=(B,),
        in_specs=[
            pl.BlockSpec((H, S, Dh), lambda b: (b, 0, 0)),
            pl.BlockSpec((H, S, Dh), lambda b: (b, 0, 0)),
            pl.BlockSpec((H, S, Dh), lambda b: (b, 0, 0)),
            pl.BlockSpec((1, 1, S), lambda b: (b, 0, 0)),
        ],
        out_specs=pl.BlockSpec((H, S, Dh), lambda b: (b, 0, 0)),
        compiler_params=_mosaic(1),
    )(q, k, v, addmask)


# ----------------------------- parameters (deterministic, synthetic) -----------------------------
def init_params(key):
    def dense(k, shape, dtype=jnp.bfloat16):
        return (0.02 * jax.random.normal(k, shape, dtype=jnp.float32)).astype(dtype)

    keys = iter(jax.random.split(key, 8 + LAYERS * 8))
    # classifier weight padded 64 -> 128 columns (lane-dense stores); pad region is zero.
    cls_w = jnp.zeros((HIDDEN, CLS_PAD), jnp.float32)
    cls_w = cls_w.at[:, :NUM_CLASSES].set(
        0.02 * jax.random.normal(next(keys), (HIDDEN, NUM_CLASSES), dtype=jnp.float32))
    p = {
        'word_emb': dense(next(keys), (EMB_VOCAB, HIDDEN), jnp.float32),
        'pos_emb': dense(next(keys), (MAX_POS, HIDDEN), jnp.float32),
        'type_emb': dense(next(keys), (2, HIDDEN), jnp.float32),
        'emb_ln_g': jnp.ones((HIDDEN,), jnp.float32),
        'emb_ln_b': jnp.zeros((HIDDEN,), jnp.float32),
        'cls_w': cls_w.astype(jnp.bfloat16),
        'cls_b': jnp.zeros((CLS_PAD,), jnp.float32),
        'layers': [],
    }
    for _ in range(LAYERS):
        p['layers'].append({
            # fused QKV: wq|wk|wv concatenated -> one (768, 2304) matmul
            'w_qkv': dense(next(keys), (HIDDEN, 3 * HIDDEN)),
            'b_qkv': jnp.zeros((3 * HIDDEN,), jnp.float32),
            'wo': dense(next(keys), (HIDDEN, HIDDEN)), 'bo': jnp.zeros((HIDDEN,), jnp.float32),
            'ln1_g': jnp.ones((HIDDEN,), jnp.float32), 'ln1_b': jnp.zeros((HIDDEN,), jnp.float32),
            'w1': dense(next(keys), (HIDDEN, INTER)), 'b1': jnp.zeros((INTER,), jnp.float32),
            'w2': dense(next(keys), (INTER, HIDDEN)), 'b2': jnp.zeros((HIDDEN,), jnp.float32),
            'ln2_g': jnp.ones((HIDDEN,), jnp.float32), 'ln2_b': jnp.zeros((HIDDEN,), jnp.float32),
        })
    return p


# ----------------------------- forward (== TorchGRUIntent.forward) -----------------------------
def torch_gru_intent_forward(params, ids, mask):
    B, S = ids.shape
    # --- embeddings (gather is plain-JAX glue) ---
    pos = jnp.arange(S, dtype=jnp.int32)
    emb = (params['word_emb'][ids]
           + params['pos_emb'][pos][None, :, :]
           + params['type_emb'][0][None, None, :])                     # (B, S, 768) f32
    x = layernorm(emb.reshape(B * S, HIDDEN), params['emb_ln_g'], params['emb_ln_b'],
                  out_dtype=jnp.bfloat16)                              # (B*S, 768) bf16

    # additive attention mask, one copy per batch: (B, 1, S)
    addmask = ((1.0 - mask.astype(jnp.float32)) * -1e9).reshape(B, 1, S)

    for layer in params['layers']:
        # fused QKV projection: one matmul, (B*S, 2304)
        qkv = linear(x, layer['w_qkv'], layer['b_qkv'])
        qkv = qkv.reshape(B, S, 3, HEADS, DH).transpose(2, 0, 3, 1, 4)  # (3, B, H, S, Dh)
        q = qkv[0].reshape(B * HEADS, S, DH)
        k = qkv[1].reshape(B * HEADS, S, DH)
        v = qkv[2].reshape(B * HEADS, S, DH)
        ctx = attention(q, k, v, addmask)                              # (B*H, S, Dh)
        ctx = ctx.reshape(B, HEADS, S, DH).transpose(0, 2, 1, 3).reshape(B * S, HIDDEN)
        # o-projection with fused residual-add + LayerNorm epilogue
        x = linear_add_ln(ctx, layer['wo'], layer['bo'], x, layer['ln1_g'], layer['ln1_b'])
        # FFN (w1 -> GELU -> w2) with fused residual-add + LayerNorm epilogue
        x = ffn_add_ln(x, layer['w1'], layer['b1'], layer['w2'], layer['b2'],
                       x, layer['ln2_g'], layer['ln2_b'])

    # classifier on the (B*S, 768) slab (per-row op, so it commutes with the transpose);
    # output padded to 128 lanes, sliced back, then transposed to (S, B, NUM_CLASSES).
    logits = linear(x, params['cls_w'], params['cls_b'], out_dtype=jnp.float32)  # (B*S, 128)
    logits = logits[:, :NUM_CLASSES].reshape(B, S, NUM_CLASSES)
    return logits.transpose(1, 0, 2)                                   # (S, B, NUM_CLASSES)


# ----------------------------- demo -----------------------------
if __name__ == "__main__":
    B, S = 2, 8
    key = jax.random.PRNGKey(0)
    k_param, k_ids = jax.random.split(key)

    params = init_params(k_param)
    ids = jax.random.randint(k_ids, (B, S), 0, EMB_VOCAB, dtype=jnp.int32)
    mask = jnp.ones((B, S), dtype=jnp.int32)
    mask = mask.at[1, 6:].set(0)     # some padding on the second example

    out = torch_gru_intent_forward(params, ids, mask)
    out = jax.block_until_ready(out)

    assert out.shape == (S, B, NUM_CLASSES), out.shape
    assert out.dtype == jnp.float32
    assert bool(jnp.all(jnp.isfinite(out)))
    print("KERNEL_OK")
</pallas_src>

<mosaic_0001>
module attributes {stable_mosaic.version = 11 : i64} {
  func.func @_ln_kernel(%arg0: i32, %arg1: memref<16x768xf32, #tpu.memory_space<vmem>>, %arg2: memref<1x768xf32, #tpu.memory_space<vmem>>, %arg3: memref<1x768xf32, #tpu.memory_space<vmem>>, %arg4: memref<16x768xbf16, #tpu.memory_space<vmem>>) attributes {dimension_semantics = [#tpu.dimension_semantics<parallel>], iteration_bounds = array<i64: 1>, scalar_prefetch = 0 : i64, scratch_operands = 0 : i64, tpu.core_type = #tpu.core_type<tc>, window_params = [{transform_indices = @transform_0, window_bounds = array<i64: 16, 768>}, {pipeline_mode = #tpu.pipeline_mode<synchronous>, transform_indices = @transform_1, window_bounds = array<i64: 1, 768>}, {pipeline_mode = #tpu.pipeline_mode<synchronous>, transform_indices = @transform_2, window_bounds = array<i64: 1, 768>}, {transform_indices = @transform_3, window_bounds = array<i64: 16, 768>}]} {
    %c0 = arith.constant 0 : index
    %c0_0 = arith.constant 0 : index
    %0 = vector.load %arg1[%c0, %c0_0] : memref<16x768xf32, #tpu.memory_space<vmem>>, vector<16x768xf32>
    %cst = arith.constant dense<0.000000e+00> : vector<16xf32>
    %1 = vector.multi_reduction <add>, %0, %cst [1] : vector<16x768xf32> to vector<16xf32>
    %2 = vector.shape_cast %1 : vector<16xf32> to vector<16x1xf32>
    %cst_1 = arith.constant 7.680000e+02 : f32
    %3 = vector.broadcast %cst_1 : f32 to vector<16x1xf32>
    %4 = arith.divf %2, %3 : vector<16x1xf32>
    %5 = vector.broadcast %4 : vector<16x1xf32> to vector<16x768xf32>
    %6 = arith.subf %0, %5 : vector<16x768xf32>
    %7 = arith.mulf %6, %6 : vector<16x768xf32>
    %cst_2 = arith.constant dense<0.000000e+00> : vector<16xf32>
    %8 = vector.multi_reduction <add>, %7, %cst_2 [1] : vector<16x768xf32> to vector<16xf32>
    %9 = vector.shape_cast %8 : vector<16xf32> to vector<16x1xf32>
    %cst_3 = arith.constant 7.680000e+02 : f32
    %10 = vector.broadcast %cst_3 : f32 to vector<16x1xf32>
    %11 = arith.divf %9, %10 : vector<16x1xf32>
    %cst_4 = arith.constant 9.99999996E-13 : f32
    %12 = vector.broadcast %cst_4 : f32 to vector<16x1xf32>
    %13 = arith.addf %11, %12 : vector<16x1xf32>
    %14 = math.rsqrt %13 : vector<16x1xf32>
    %15 = vector.broadcast %14 : vector<16x1xf32> to vector<16x768xf32>
    %16 = arith.mulf %6, %15 : vector<16x768xf32>
    %c0_5 = arith.constant 0 : index
    %c0_6 = arith.constant 0 : index
    %17 = vector.load %arg2[%c0_5, %c0_6] : memref<1x768xf32, #tpu.memory_space<vmem>>, vector<1x768xf32>
    %18 = vector.broadcast %17 : vector<1x768xf32> to vector<16x768xf32>
    %19 = arith.mulf %16, %18 : vector<16x768xf32>
    %c0_7 = arith.constant 0 : index
    %c0_8 = arith.constant 0 : index
    %20 = vector.load %arg3[%c0_7, %c0_8] : memref<1x768xf32, #tpu.memory_space<vmem>>, vector<1x768xf32>
    %21 = vector.broadcast %20 : vector<1x768xf32> to vector<16x768xf32>
    %22 = arith.addf %19, %21 : vector<16x768xf32>
    %23 = arith.truncf %22 : vector<16x768xf32> to vector<16x768xbf16>
    %c0_9 = arith.constant 0 : index
    %c0_10 = arith.constant 0 : index
    %24 = vector.load %arg4[%c0_9, %c0_10] : memref<16x768xbf16, #tpu.memory_space<vmem>>, vector<16x768xbf16>
    tpu.vector_store %arg4[%c0_9, %c0_10], %23 {strides = array<i32>} : memref<16x768xbf16, #tpu.memory_space<vmem>>, vector<16x768xbf16>,
    return
  }
  func.func @transform_0(%arg0: i32) -> (i32, i32) {
    %c0_i32 = arith.constant 0 : i32
    %c0_i32_0 = arith.constant 0 : i32
    return %arg0, %c0_i32 : i32, i32
  }
  func.func @transform_1(%arg0: i32) -> (i32, i32) {
    %c0_i32 = arith.constant 0 : i32
    %c0_i32_0 = arith.constant 0 : i32
    %c0_i32_1 = arith.constant 0 : i32
    return %c0_i32, %c0_i32_0 : i32, i32
  }
  func.func @transform_2(%arg0: i32) -> (i32, i32) {
    %c0_i32 = arith.constant 0 : i32
    %c0_i32_0 = arith.constant 0 : i32
    %c0_i32_1 = arith.constant 0 : i32
    return %c0_i32, %c0_i32_0 : i32, i32
  }
  func.func @transform_3(%arg0: i32) -> (i32, i32) {
    %c0_i32 = arith.constant 0 : i32
    %c0_i32_0 = arith.constant 0 : i32
    return %arg0, %c0_i32 : i32, i32
  }
}

</mosaic_0001>

<bundles_post_ra>
// kernel: tpu_custom_call.1
= control target key start
LH: loop header
LB: loop body
LE: loop exit
PB: predicated region body
PF: predicated region fallthrough
CT: control target
= control target key end

     0   :  { %8 = vsyncpa [#allocation3], 0  ;;  %s480_s0 = inlined_call_operand.hbm [shape: f32[16,768], index: 0, kind: input, shape index: {}]   ;;  %s481_s1 = inlined_call_operand.hbm [shape: f32[1,768], index: 1, kind: input, shape index: {}]   ;;  %s482_s2 = inlined_call_operand.vmem [shape: f32[1,768], index: 2, kind: input, shape index: {}]   ;;  %s483_s3 = inlined_call_operand.hbm [shape: bf16[16,768], index: 3, kind: output, shape index: {}]  }
   0x1   :  { %9 = vsyncpa [#allocation6], 0 }
   0x2   :  { %10 = vsyncpa [#allocation4], 0  ;;  %s369_s12 = smov [#allocation2]   ;;  %s297_s16 = scalar_lea.hbm %s480_s0, 1536 }
   0x3   :  { %s16_s13 = sshll.u32 %s369_s12, 4  ;;  %p298_p0 = scmp.ne.s32.totalorder %s480_s0, %s297_s16  ;;  %s17_s13 = int_to_ptr.vmem [resolvable:$true] %s16_s13 }
   0x4   :  { %p301_p1 = scmp.lt.u32.totalorder %s297_s16, %s480_s0 }
   0x6   :  { %p303_p2 = pnand %p301_p1, %p298_p0 }
   0x8   :  { %306 = shalt.err (!%p303_p2)
}
   0x9   :  { %s307_s21 = scalar_lea.vmem %s17_s13, 1536  ;;  %p312_p4 = scmp.lt.s32.totalorder %s17_s13, %s17_s13 }
   0xa   :  { %p308_p3 = scmp.ne.s32.totalorder %s17_s13, %s307_s21  ;;  %p313_p5 = scmp.lt.s32.totalorder %s307_s21, %s307_s21 }
   0xc   :  { %p314_p6 = por %p313_p5, %p312_p4 }
   0xe   :  { %p315_p7 = pnand %p314_p6, %p308_p3 }
  0x10   :  { %318 = shalt.err (!%p315_p7)
}
  0x11   :  { %s370_s22 = smov 768   ;;  %s371_s23 = smov 48  }
  0x12   :  { %22 = dma.hbm_to_vmem [thread:$0]  %s480_s0, 1536, %s17_s13, [#allocation3], %s370_s22, %s370_s22, %s371_s23  }
  0x13   :  { %s372_s26 = smov [#allocation5]   ;;  %s319_s30 = scalar_lea.hbm %s481_s1, 96 }
  0x14   :  { %s29_s27 = sshll.u32 %s372_s26, 4  ;;  %p320_p8 = scmp.ne.s32.totalorder %s481_s1, %s319_s30  ;;  %s30_s27 = int_to_ptr.vmem [resolvable:$true] %s29_s27 }
  0x15   :  { %p323_p9 = scmp.lt.u32.totalorder %s319_s30, %s481_s1 }
  0x17   :  { %p325_p10 = pnand %p323_p9, %p320_p8 }
  0x19   :  { %328 = shalt.err (!%p325_p10)
}
  0x1a   :  { %s329_s8 = scalar_lea.vmem %s30_s27, 96  ;;  %p334_p12 = scmp.lt.s32.totalorder %s30_s27, %s30_s27 }
  0x1b   :  { %p330_p11 = scmp.ne.s32.totalorder %s30_s27, %s329_s8  ;;  %p335_p13 = scmp.lt.s32.totalorder %s329_s8, %s329_s8 }
  0x1d   :  { %p336_p0 = por %p335_p13, %p334_p12 }
  0x1f   :  { %p337_p1 = pnand %p336_p0, %p330_p11 }
  0x21   :  { %340 = shalt.err (!%p337_p1)
}
  0x22   :  { %32 = dma.hbm_to_vmem [thread:$0]  %s481_s1, 96, %s30_s27, [#allocation6]  }
  0x23   :  { %363 = dma.done.wait [#allocation3], 1536  }
  0x24   :  { %364 = vsyncadd [#allocation3], 4294965760 }
  0x25   :  { %365 = dma.done.wait [#allocation6], 96  }
  0x26   :  { %366 = vsyncadd [#allocation6], 4294967200  ;;  %v41_v0 = vld [vmem:[#allocation2] sm:$0xff]  ;;  %v42_v1 = vld [vmem:[#allocation2 + $0x8] sm:$0xff]  ;;  %v128_v62 = vlaneseq }
  0x27   :  { %v43_v2 = vld [vmem:[#allocation2 + $0x10] sm:$0xff]  ;;  %v44_v3 = vld [vmem:[#allocation2 + $0x18] sm:$0xff]  ;;  %v53_v4 = vadd.f32 %v42_v1, %v41_v0  ;;  %v49_v7 = vld [vmem:[#allocation2 + $0x40] sm:$0xff] }
  0x28   :  { %v47_v5 = vld [vmem:[#allocation2 + $0x30] sm:$0xff]  ;;  %v48_v6 = vld [vmem:[#allocation2 + $0x38] sm:$0xff]  ;;  %v45_v10 = vld [vmem:[#allocation2 + $0x20] sm:$0xff] }
  0x29   :  { %v54_v8 = vadd.f32 %v53_v4, %v43_v2  ;;  %v60_v9 = vadd.f32 %v48_v6, %v47_v5  ;;  %v50_v11 = vld [vmem:[#allocation2 + $0x48] sm:$0xff]  ;;  %v51_v15 = vld [vmem:[#allocation2 + $0x50] sm:$0xff]  ;;  %v52_v18 = vld [vmem:[#allocation2 + $0x58] sm:$0xff] }
  0x2a   :  { %v46_v14 = vld [vmem:[#allocation2 + $0x28] sm:$0xff] }
  0x2b   :  { %v55_v12 = vadd.f32 %v54_v8, %v44_v3  ;;  %v61_v13 = vadd.f32 %v60_v9, %v49_v7  ;;  %v126_v8 = vld [vmem:[#allocation5] sm:$0x3f] }
  0x2d   :  { %v56_v16 = vadd.f32 %v55_v12, %v45_v10  ;;  %v62_v17 = vadd.f32 %v61_v13, %v50_v11 }
  0x2f   :  { %v57_v19 = vadd.f32 %v56_v16, %v46_v14  ;;  %v63_v20 = vadd.f32 %v62_v17, %v51_v15 }
  0x31   :  { %58 = vadd.xlane.f32.xlu0 %v57_v19  ;;  %v64_v21 = vadd.f32 %v63_v20, %v52_v18 }
  0x35   :  { %65 = vadd.xlane.f32.xlu0 %v64_v21 }
  0xbe   :  { %v59_v22 = vpop.xlane.xlu0 %58 }
  0xbf   :  { %v68_v23 = vmul.f32 0.0013020834, %v59_v22 }
  0xc1   :  { %v420_v24 = vsub.f32 %v41_v0, %v68_v23  ;;  %v422_v25 = vsub.f32 %v42_v1, %v68_v23  ;;  %v424_v26 = vsub.f32 %v43_v2, %v68_v23  ;;  %v426_v28 = vsub.f32 %v44_v3, %v68_v23 }
  0xc2   :  { %v66_v27 = vpop.xlane.xlu0 %65  ;;  %v74_v32 = vsub.f32 %v45_v10, %v68_v23  ;;  %v75_v38 = vsub.f32 %v46_v14, %v68_v23  ;;  %v129_v2 = vshrl.u32 %v128_v62, 7 }
  0xc3   :  { %v69_v29 = vmul.f32 0.0013020834, %v66_v27  ;;  %v82_v30 = vmul.f32 %v420_v24, %v420_v24  ;;  %v83_v31 = vmul.f32 %v422_v25, %v422_v25  ;;  %v84_v33 = vmul.f32 %v424_v26, %v424_v26 }
  0xc4   :  { %v85_v39 = vmul.f32 %v426_v28, %v426_v28  ;;  %v86_v44 = vmul.f32 %v74_v32, %v74_v32  ;;  %v87_v49 = vmul.f32 %v75_v38, %v75_v38  ;;  %v130_v4 = vsub.s32 0, %v129_v2 }
  0xc5   :  { %v94_v34 = vadd.f32 %v83_v31, %v82_v30  ;;  %v434_v35 = vsub.f32 %v47_v5, %v69_v29  ;;  %v436_v36 = vsub.f32 %v48_v6, %v69_v29  ;;  %v438_v37 = vsub.f32 %v49_v7, %v69_v29 }
  0xc6   :  { %v442_v41 = vsub.f32 %v50_v11, %v69_v29  ;;  %v448_v46 = vsub.f32 %v51_v15, %v69_v29  ;;  %v81_v51 = vsub.f32 %v52_v18, %v69_v29  ;;  %v134_v5 = vsub.s32 1, %v129_v2  ;;  %v170_v11 = vld [vmem:[%s482_s2] sm:$0x3f]  ;;  %s373_s2 = smov [#allocation7]  }
  0xc7   :  { %v95_v40 = vadd.f32 %v94_v34, %v84_v33  ;;  %v88_v42 = vmul.f32 %v434_v35, %v434_v35  ;;  %v89_v43 = vmul.f32 %v436_v36, %v436_v36  ;;  %v90_v47 = vmul.f32 %v438_v37, %v438_v37  ;;  %s261_s11 = sshll.u32 %s373_s2, 4  ;;  %s262_s11 = int_to_ptr.vmem [resolvable:$true] %s261_s11 }
  0xc8   :  { %v91_v52 = vmul.f32 %v442_v41, %v442_v41  ;;  %v92_v55 = vmul.f32 %v448_v46, %v448_v46  ;;  %v93_v57 = vmul.f32 %v81_v51, %v81_v51  ;;  %v138_v6 = vsub.s32 2, %v129_v2  ;;  %s341_s12 = scalar_lea.vmem %s262_s11, 768  ;;  %p346_p3 = scmp.lt.s32.totalorder %s262_s11, %s262_s11 }
  0xc9   :  { %v96_v45 = vadd.f32 %v95_v40, %v85_v39  ;;  %v101_v48 = vadd.f32 %v89_v43, %v88_v42  ;;  %v142_v7 = vsub.s32 3, %v129_v2  ;;  %v146_v9 = vsub.s32 4, %v129_v2  ;;  %p342_p2 = scmp.ne.s32.totalorder %s262_s11, %s341_s12  ;;  %p347_p4 = scmp.lt.s32.totalorder %s341_s12, %s341_s12 }
  0xca   :  { %v150_v10 = vsub.s32 5, %v129_v2  ;;  %v131_v12 = vrot.slane %v126_v8, %v130_v4  ;;  %v135_v13 = vrot.slane %v126_v8, %v134_v5  ;;  %v139_v14 = vrot.slane %v126_v8, %v138_v6 }
  0xcb   :  { %v97_v50 = vadd.f32 %v96_v45, %v86_v44  ;;  %v102_v53 = vadd.f32 %v101_v48, %v90_v47  ;;  %v143_v15 = vrot.slane %v126_v8, %v142_v7  ;;  %v147_v17 = vrot.slane %v126_v8, %v146_v9  ;;  %p348_p5 = por %p347_p4, %p346_p3 }
  0xcc   :  { %v151_v18 = vrot.slane %v126_v8, %v150_v10  ;;  %v175_v19 = vrot.slane %v170_v11, %v130_v4  ;;  %v179_v20 = vrot.slane %v170_v11, %v134_v5  ;;  %v183_v31 = vrot.slane %v170_v11, %v138_v6 }
  0xcd   :  { %v98_v54 = vadd.f32 %v97_v50, %v87_v49  ;;  %v103_v56 = vadd.f32 %v102_v53, %v91_v52  ;;  %v187_v33 = vrot.slane %v170_v11, %v142_v7  ;;  %v191_v40 = vrot.slane %v170_v11, %v146_v9  ;;  %p349_p6 = pnand %p348_p5, %p342_p2 }
  0xce   :  { %v195_v42 = vrot.slane %v170_v11, %v150_v10 }
  0xcf   :  { %99 = vadd.xlane.f32.xlu1 %v98_v54  ;;  %v104_v58 = vadd.f32 %v103_v56, %v92_v55 }
  0xd1   :  { %v105_v59 = vadd.f32 %v104_v58, %v93_v57 }
  0xd3   :  { %106 = vadd.xlane.f32.xlu1 %v105_v59 }
 0x15c   :  { %v100_v60 = vpop.xlane.xlu1 %99 }
 0x15d   :  { %v108_v61 = vmul.f32 0.0013020834, %v100_v60 }
 0x15f   :  { %v110_v63 = vadd.f32 1e-12, %v108_v61 }
 0x160   :  { %v107_v0 = vpop.xlane.xlu1 %106 }
 0x161   :  { %293 = vrsqrt.f32 %v110_v63  ;;  %v109_v1 = vmul.f32 0.0013020834, %v107_v0 }
 0x163   :  { %v111_v3 = vadd.f32 1e-12, %v109_v1 }
 0x165   :  { %295 = vrsqrt.f32 %v111_v3 }
 0x16b   :  { %v294_v16 = vpop.eup %293 }
 0x16c   :  { %v114_v21 = vmul.f32 %v294_v16, %v420_v24  ;;  %v115_v22 = vmul.f32 %v294_v16, %v422_v25  ;;  %v116_v23 = vmul.f32 %v294_v16, %v424_v26  ;;  %v117_v27 = vmul.f32 %v294_v16, %v426_v28 }
 0x16d   :  { %v118_v29 = vmul.f32 %v294_v16, %v74_v32  ;;  %v119_v30 = vmul.f32 %v294_v16, %v75_v38 }
 0x16e   :  { %v158_v34 = vmul.f32 %v131_v12, %v114_v21  ;;  %v159_v39 = vmul.f32 %v135_v13, %v115_v22  ;;  %v160_v44 = vmul.f32 %v139_v14, %v116_v23  ;;  %v161_v45 = vmul.f32 %v143_v15, %v117_v27 }
 0x16f   :  { %v296_v43 = vpop.eup %295  ;;  %v162_v47 = vmul.f32 %v147_v17, %v118_v29  ;;  %v163_v48 = vmul.f32 %v151_v18, %v119_v30 }
 0x170   :  { %v120_v24 = vmul.f32 %v296_v43, %v434_v35  ;;  %v121_v25 = vmul.f32 %v296_v43, %v436_v36  ;;  %v122_v26 = vmul.f32 %v296_v43, %v438_v37  ;;  %v123_v28 = vmul.f32 %v296_v43, %v442_v41 }
 0x171   :  { %v124_v32 = vmul.f32 %v296_v43, %v448_v46  ;;  %v125_v38 = vmul.f32 %v296_v43, %v81_v51  ;;  %v202_v49 = vadd.f32 %v175_v19, %v158_v34  ;;  %v203_v50 = vadd.f32 %v179_v20, %v159_v39 }
 0x172   :  { %v164_v52 = vmul.f32 %v131_v12, %v120_v24  ;;  %v165_v53 = vmul.f32 %v135_v13, %v121_v25  ;;  %v166_v54 = vmul.f32 %v139_v14, %v122_v26  ;;  %v167_v55 = vmul.f32 %v143_v15, %v123_v28 }
 0x173   :  { %v168_v56 = vmul.f32 %v147_v17, %v124_v32  ;;  %v169_v57 = vmul.f32 %v151_v18, %v125_v38  ;;  %v204_v58 = vadd.f32 %v183_v31, %v160_v44  ;;  %v205_v59 = vadd.f32 %v187_v33, %v161_v45 }
 0x174   :  { %v206_v35 = vadd.f32 %v191_v40, %v162_v47  ;;  %v207_v60 = vadd.f32 %v195_v42, %v163_v48  ;;  %v208_v36 = vadd.f32 %v175_v19, %v164_v52  ;;  %v209_v61 = vadd.f32 %v179_v20, %v165_v53 }
 0x175   :  { %v210_v37 = vadd.f32 %v183_v31, %v166_v54  ;;  %v211_v41 = vadd.f32 %v187_v33, %v167_v55  ;;  %v212_v46 = vadd.f32 %v191_v40, %v168_v56  ;;  %v213_v51 = vadd.f32 %v195_v42, %v169_v57 }
 0x176   :  { %v280_v62 = vpack.c.bf16 %v203_v50, %v202_v49  ;;  %v281_v63 = vpack.c.bf16 %v205_v59, %v204_v58  ;;  %v282_v0 = vpack.c.bf16 %v207_v60, %v206_v35  ;;  %v283_v1 = vpack.c.bf16 %v209_v61, %v208_v36 }
 0x177   :  { %v284_v2 = vpack.c.bf16 %v211_v41, %v210_v37  ;;  %v285_v3 = vpack.c.bf16 %v213_v51, %v212_v46 }
 0x178   :  { %250 = vst [vmem:[#allocation7] sm:$0xff] %v280_v62  ;;  %251 = vst [vmem:[#allocation7 + $0x8] sm:$0xff] %v281_v63 }
 0x179   :  { %252 = vst [vmem:[#allocation7 + $0x10] sm:$0xff] %v282_v0  ;;  %253 = vst [vmem:[#allocation7 + $0x18] sm:$0xff] %v283_v1 }
 0x17a   :  { %254 = vst [vmem:[#allocation7 + $0x20] sm:$0xff] %v284_v2  ;;  %255 = vst [vmem:[#allocation7 + $0x28] sm:$0xff] %v285_v3 }
 0x17b   :  { %352 = shalt.err (!%p349_p6)
}
 0x17c   :  { %s353_s15 = scalar_lea.hbm %s483_s3, 768 }
 0x17d   :  { %p354_p7 = scmp.ne.s32.totalorder %s483_s3, %s353_s15  ;;  %p357_p8 = scmp.lt.u32.totalorder %s353_s15, %s483_s3 }
 0x17f   :  { %p359_p9 = pnand %p357_p8, %p354_p7 }
 0x181   :  { %362 = shalt.err (!%p359_p9)
}
 0x182   :  { %s374_s20 = smov 384   ;;  %s375_s21 = smov 24  }
 0x183   :  { %267 = dma.vmem_to_hbm [thread:$0]  %s262_s11, 768, %s483_s3, [#allocation4], %s374_s20, %s374_s20, %s375_s21  }
 0x184   :  { %367 = dma.done.wait [#allocation4], 768  }
 0x185   :  { %368 = vsyncadd [#allocation4], 4294966528 }
 0x186   :  { %271 = vsyncpa [#allocation3], 1 }
 0x187   :  { %272 = vsyncpa [#allocation6], 1 }
 0x188   :  { %273 = vsyncpa [#allocation4], 1 }

</bundles_post_ra>
